<compile_context>
chip_gen: v5e
topology: v5e:2x2
jax: 0.10.0
libtpu: 0.0.40
codegen_flags: <defaults>
</compile_context>

<pallas_src>
import numpy as np
import jax
import jax.numpy as jnp
from jax.experimental import pallas as pl
from jax.experimental.pallas import tpu as pltpu


# ------------------------------- small helpers -------------------------------

def _round_up(x, m):
    return (x + m - 1) // m * m


def squaredcos_cap_v2_betas(num_train_timesteps, max_beta=0.999):
    """diffusers 'squaredcos_cap_v2' beta schedule."""
    def alpha_bar(t):
        return np.cos((t + 0.008) / 1.008 * np.pi / 2) ** 2
    betas = []
    for i in range(num_train_timesteps):
        t1 = i / num_train_timesteps
        t2 = (i + 1) / num_train_timesteps
        betas.append(min(1.0 - alpha_bar(t2) / alpha_bar(t1), max_beta))
    return np.asarray(betas, dtype=np.float32)


def build_ddim_scheduler_tables(num_train_timesteps):
    betas = squaredcos_cap_v2_betas(num_train_timesteps)
    alphas = 1.0 - betas
    alphas_cumprod = np.cumprod(alphas, axis=0)
    return {
        "sqrt_acp": jnp.asarray(np.sqrt(alphas_cumprod), dtype=jnp.float32),
        "sqrt_omacp": jnp.asarray(np.sqrt(1.0 - alphas_cumprod), dtype=jnp.float32),
    }


def timestep_embedding(t, dim):
    """Sinusoidal timestep embedding (glue; tiny)."""
    assert dim % 2 == 0, "timestep embedding dim must be even"
    half = dim // 2
    freqs = jnp.exp(-jnp.log(10000.0) * jnp.arange(half, dtype=jnp.float32) / half)
    args = t.astype(jnp.float32)[:, None] * freqs[None, :]
    return jnp.concatenate([jnp.sin(args), jnp.cos(args)], axis=-1)


# -------------------------------- Pallas kernel -------------------------------

def dp_loss_kernel(
    rows_ref,    # (TB, 8)  f32: col0=sqrt_acp[t], col1=sqrt(1-acp[t]), col2=valid mask
    act_ref,     # (TB, Fp) bf16 clean action (flattened, lane-padded)
    noise_ref,   # (TB, Fp) bf16 gaussian noise
    cond_ref,    # (TB, Cp) bf16 concat(t_emb, obs), lane-padded
    w1a_ref,     # (Fp, H)  bf16 (VMEM-resident across grid)
    w1c_ref,     # (Cp, H)  bf16 (VMEM-resident)
    b1_ref,      # (1, H)   f32
    w2_ref,      # (H, Fp)  bf16 (VMEM-resident)
    b2_ref,      # (1, Fp)  f32
    psum_ref,    # (1, 1, Fp) f32 per-lane partial squared-error sums for this block
):
    rows = rows_ref[...]
    s_a = rows[:, 0:1]          # sqrt(alpha_cumprod[t])
    s_n = rows[:, 1:2]          # sqrt(1 - alpha_cumprod[t])
    mask = rows[:, 2:3]         # 1.0 for real rows, 0.0 for batch padding

    act = act_ref[...].astype(jnp.float32)
    noise = noise_ref[...].astype(jnp.float32)

    # DDIM add_noise: noisy = sqrt_acp[t] * action + sqrt(1-acp[t]) * noise
    # (kept fused in-kernel; rides free VPU slots under the MXU work)
    noisy = s_a * act + s_n * noise

    # noise_pred_net: 2-layer MLP on concat(noisy, t_emb, obs).
    # The conditioning matmuls (t_emb, obs) are fused into a single K=Cp matmul.
    h = (
        jnp.dot(noisy.astype(jnp.bfloat16), w1a_ref[...],
                preferred_element_type=jnp.float32)
        + jnp.dot(cond_ref[...], w1c_ref[...],
                  preferred_element_type=jnp.float32)
        + b1_ref[...]
    )
    h = jnp.maximum(h, 0.0)
    noise_pred = (
        jnp.dot(h.astype(jnp.bfloat16), w2_ref[...],
                preferred_element_type=jnp.float32)
        + b2_ref[...]
    )

    # masked squared error; padded batch rows and padded lanes contribute exactly 0
    diff = (noise_pred - noise) * mask
    partial = jnp.sum(diff * diff, axis=0, keepdims=True)   # (1, Fp) per-lane sums
    psum_ref[...] = partial[None]                            # (1, 1, Fp)


# --------------------------- parameter packing (once) --------------------------

def prepare_noise_pred_params(raw, lane=128):
    """Fuse w1t/w1o into one conditioning weight and zero-pad to lane-dense
    shapes; bf16 storage for the MXU operands. One-time packing."""
    F, H = raw["w1a"].shape
    E = raw["w1t"].shape[0]
    O = raw["w1o"].shape[0]
    Fp = _round_up(F, lane)
    Cp = _round_up(E + O, lane)

    w1a = jnp.zeros((Fp, H), jnp.float32).at[:F, :].set(raw["w1a"])
    w1c = jnp.zeros((Cp, H), jnp.float32).at[:E + O, :].set(
        jnp.concatenate([raw["w1t"], raw["w1o"]], axis=0))
    w2 = jnp.zeros((H, Fp), jnp.float32).at[:, :F].set(raw["w2"])
    b2 = jnp.zeros((1, Fp), jnp.float32).at[:, :F].set(raw["b2"].reshape(1, F))

    return {
        "w1a": w1a.astype(jnp.bfloat16),
        "w1c": w1c.astype(jnp.bfloat16),
        "b1": raw["b1"].astype(jnp.float32).reshape(1, H),
        "w2": w2.astype(jnp.bfloat16),
        "b2": b2,
        "dims": (F, E, O, H, Fp, Cp),
    }


# ------------------------------------ wrapper -----------------------------------

def diffusion_policy_loss(obs, action, noise, t, packed, sched,
                          num_train_noise_samples=1, block_rows=512):
    """Mirrors DiffusionPolicy.forward (training loss)."""
    F, E, O, H, Fp, Cp = packed["dims"]

    if num_train_noise_samples > 1:
        # repeat_interleave on obs/action; `noise` and `t` are drawn per noise
        # sample and must already be sized for the expanded batch.
        obs = jnp.repeat(obs, num_train_noise_samples, axis=0)
        action = jnp.repeat(action, num_train_noise_samples, axis=0)

    B = action.shape[0]
    assert noise.shape[0] == B and t.shape[0] == B, \
        "noise / t must match the (expanded) batch size"
    assert action.reshape(B, -1).shape[1] == F and obs.shape[1] == O

    # batch tiling: TB rows per grid step (multiple of 8 sublanes)
    TB = _round_up(min(block_rows, _round_up(B, 8)), 8)
    Bp = _round_up(B, TB)
    num_blocks = Bp // TB

    # ---- glue: flatten, pad to lane-dense shapes, bf16 storage ----
    act_flat = action.reshape(B, F).astype(jnp.float32)
    noise_flat = noise.reshape(B, F).astype(jnp.float32)
    act_p = jnp.zeros((Bp, Fp), jnp.float32).at[:B, :F].set(act_flat).astype(jnp.bfloat16)
    noise_p = jnp.zeros((Bp, Fp), jnp.float32).at[:B, :F].set(noise_flat).astype(jnp.bfloat16)

    temb = timestep_embedding(t, E)
    cond = jnp.concatenate([temb, obs.astype(jnp.float32)], axis=-1)       # (B, E+O)
    cond_p = jnp.zeros((Bp, Cp), jnp.float32).at[:B, :E + O].set(cond).astype(jnp.bfloat16)

    # per-row scalars packed into one small array (avoids three (B,1) tensors)
    rows = jnp.zeros((Bp, 8), jnp.float32)
    rows = rows.at[:B, 0].set(sched["sqrt_acp"][t])
    rows = rows.at[:B, 1].set(sched["sqrt_omacp"][t])
    rows = rows.at[:B, 2].set(1.0)

    flops = 2 * Bp * H * (Fp + Cp + Fp)
    bytes_accessed = (
        2 * (act_p.size + noise_p.size + cond_p.size)   # bf16 activations
        + 4 * rows.size
        + 2 * (Fp * H + Cp * H + H * Fp)                # bf16 weights (resident)
        + 4 * (H + Fp)                                  # f32 biases
        + 4 * num_blocks * Fp                           # f32 partial sums out
    )

    partials = pl.pallas_call(
        dp_loss_kernel,
        out_shape=jax.ShapeDtypeStruct((num_blocks, 1, Fp), jnp.float32),
        grid=(num_blocks,),
        in_specs=[
            pl.BlockSpec((TB, 8), lambda i: (i, 0)),     # rows (s_a, s_n, mask)
            pl.BlockSpec((TB, Fp), lambda i: (i, 0)),    # action tile
            pl.BlockSpec((TB, Fp), lambda i: (i, 0)),    # noise tile
            pl.BlockSpec((TB, Cp), lambda i: (i, 0)),    # conditioning tile
            pl.BlockSpec((Fp, H), lambda i: (0, 0)),     # w1a  (VMEM-resident)
            pl.BlockSpec((Cp, H), lambda i: (0, 0)),     # w1c  (VMEM-resident)
            pl.BlockSpec((1, H), lambda i: (0, 0)),      # b1
            pl.BlockSpec((H, Fp), lambda i: (0, 0)),     # w2   (VMEM-resident)
            pl.BlockSpec((1, Fp), lambda i: (0, 0)),     # b2
        ],
        out_specs=pl.BlockSpec((1, 1, Fp), lambda i: (i, 0, 0)),
        compiler_params=pltpu.CompilerParams(
            dimension_semantics=("parallel",),           # independent batch blocks
            vmem_limit_bytes=32 * 1024 * 1024,           # explicit (v7x: 64 MiB phys)
        ),
        cost_estimate=pl.CostEstimate(
            flops=flops, transcendentals=0, bytes_accessed=bytes_accessed),
    )(rows, act_p, noise_p, cond_p,
      packed["w1a"], packed["w1c"], packed["b1"], packed["w2"], packed["b2"])

    # F.mse_loss(noise_pred, noise), reduction='mean' (tiny final reduce in JAX)
    return jnp.sum(partials) / float(B * F)


# TODO(synk): DiffusionPolicy.sample (the iterative DDIM denoising loop) is not
# implemented; only forward() (training loss) is translated, per the reference.


# ---------------------------- pure-JAX reference (check) ----------------------------

def reference_loss(obs, action, noise, t, raw_params, sched):
    B = action.shape[0]
    act = action.reshape(B, -1).astype(jnp.float32)
    noi = noise.reshape(B, -1).astype(jnp.float32)
    s_a = sched["sqrt_acp"][t][:, None]
    s_n = sched["sqrt_omacp"][t][:, None]
    noisy = s_a * act + s_n * noi
    temb = timestep_embedding(t, raw_params["w1t"].shape[0])
    h = jnp.maximum(
        noisy @ raw_params["w1a"] + temb @ raw_params["w1t"]
        + obs.astype(jnp.float32) @ raw_params["w1o"] + raw_params["b1"], 0.0)
    pred = h @ raw_params["w2"] + raw_params["b2"]
    return jnp.mean((pred - noi) ** 2)


# ------------------------------------- main -------------------------------------

if __name__ == "__main__":
    B = 2                    # batch
    ACTION_LEN = 8           # action_len
    ACTION_DIM = 4           # action_dim
    OBS_DIM = 32             # global_cond dim
    EMB_DIM = 32             # timestep embedding dim (even)
    HIDDEN = 128             # MLP hidden width
    NUM_TRAIN_STEPS = 100
    NUM_NOISE_SAMPLES = 2    # exercises the repeat_interleave path
    F_DIM = ACTION_LEN * ACTION_DIM

    key = jax.random.PRNGKey(0)
    (k_obs, k_act, k_noise, k_t,
     k_w1a, k_w1t, k_w1o, k_w2) = jax.random.split(key, 8)

    obs = jax.random.normal(k_obs, (B, OBS_DIM), dtype=jnp.float32)
    action = jax.random.normal(k_act, (B, ACTION_LEN, ACTION_DIM), dtype=jnp.float32)

    # torch.randn_like / torch.randint operate on the expanded batch in the
    # reference; draw them at B * num_train_noise_samples here (deterministic).
    B_exp = B * NUM_NOISE_SAMPLES
    noise = jax.random.normal(k_noise, (B_exp, ACTION_LEN, ACTION_DIM), dtype=jnp.float32)
    t = jax.random.randint(k_t, (B_exp,), 0, NUM_TRAIN_STEPS, dtype=jnp.int32)

    scale = 0.02
    raw_params = {
        "w1a": scale * jax.random.normal(k_w1a, (F_DIM, HIDDEN), dtype=jnp.float32),
        "w1t": scale * jax.random.normal(k_w1t, (EMB_DIM, HIDDEN), dtype=jnp.float32),
        "w1o": scale * jax.random.normal(k_w1o, (OBS_DIM, HIDDEN), dtype=jnp.float32),
        "b1": jnp.zeros((1, HIDDEN), dtype=jnp.float32),
        "w2": scale * jax.random.normal(k_w2, (HIDDEN, F_DIM), dtype=jnp.float32),
        "b2": jnp.zeros((1, F_DIM), dtype=jnp.float32),
    }
    packed = prepare_noise_pred_params(raw_params)
    sched = build_ddim_scheduler_tables(NUM_TRAIN_STEPS)

    loss = diffusion_policy_loss(obs, action, noise, t, packed, sched,
                                 num_train_noise_samples=NUM_NOISE_SAMPLES)
    loss = jax.block_until_ready(loss)

    # correctness: compare against the f32 pure-JAX reference (loose tol for bf16 storage)
    obs_exp = jnp.repeat(obs, NUM_NOISE_SAMPLES, axis=0)
    action_exp = jnp.repeat(action, NUM_NOISE_SAMPLES, axis=0)
    ref = jax.block_until_ready(reference_loss(obs_exp, action_exp, noise, t,
                                               raw_params, sched))

    assert loss.shape == () and bool(jnp.isfinite(loss))
    rel = abs(float(loss) - float(ref)) / max(abs(float(ref)), 1e-6)
    assert rel < 5e-2, f"kernel loss {float(loss)} vs reference {float(ref)} (rel={rel})"
    print("KERNEL_OK")
</pallas_src>

<mosaic_0001>
module attributes {stable_mosaic.version = 11 : i64} {
  func.func @dp_loss_kernel(%arg0: i32, %arg1: memref<8x8xf32, #tpu.memory_space<vmem>>, %arg2: memref<8x128xbf16, #tpu.memory_space<vmem>>, %arg3: memref<8x128xbf16, #tpu.memory_space<vmem>>, %arg4: memref<8x128xbf16, #tpu.memory_space<vmem>>, %arg5: memref<128x128xbf16, #tpu.memory_space<vmem>>, %arg6: memref<128x128xbf16, #tpu.memory_space<vmem>>, %arg7: memref<1x128xf32, #tpu.memory_space<vmem>>, %arg8: memref<128x128xbf16, #tpu.memory_space<vmem>>, %arg9: memref<1x128xf32, #tpu.memory_space<vmem>>, %arg10: memref<1x1x128xf32, #tpu.memory_space<vmem>>) attributes {dimension_semantics = [#tpu.dimension_semantics<parallel>], iteration_bounds = array<i64: 1>, scalar_prefetch = 0 : i64, scratch_operands = 0 : i64, tpu.core_type = #tpu.core_type<tc>, window_params = [{transform_indices = @transform_0, window_bounds = array<i64: 8, 8>}, {transform_indices = @transform_1, window_bounds = array<i64: 8, 128>}, {transform_indices = @transform_2, window_bounds = array<i64: 8, 128>}, {transform_indices = @transform_3, window_bounds = array<i64: 8, 128>}, {pipeline_mode = #tpu.pipeline_mode<synchronous>, transform_indices = @transform_4, window_bounds = array<i64: 128, 128>}, {pipeline_mode = #tpu.pipeline_mode<synchronous>, transform_indices = @transform_5, window_bounds = array<i64: 128, 128>}, {pipeline_mode = #tpu.pipeline_mode<synchronous>, transform_indices = @transform_6, window_bounds = array<i64: 1, 128>}, {pipeline_mode = #tpu.pipeline_mode<synchronous>, transform_indices = @transform_7, window_bounds = array<i64: 128, 128>}, {pipeline_mode = #tpu.pipeline_mode<synchronous>, transform_indices = @transform_8, window_bounds = array<i64: 1, 128>}, {transform_indices = @transform_9, window_bounds = array<i64: 1, 1, 128>}]} {
    %c0 = arith.constant 0 : index
    %c0_0 = arith.constant 0 : index
    %0 = vector.load %arg1[%c0, %c0_0] : memref<8x8xf32, #tpu.memory_space<vmem>>, vector<8x8xf32>
    %1 = vector.extract_strided_slice %0 {offsets = [0, 0], sizes = [8, 1], strides = [1, 1]} : vector<8x8xf32> to vector<8x1xf32>
    %2 = vector.extract_strided_slice %0 {offsets = [0, 1], sizes = [8, 1], strides = [1, 1]} : vector<8x8xf32> to vector<8x1xf32>
    %3 = vector.extract_strided_slice %0 {offsets = [0, 2], sizes = [8, 1], strides = [1, 1]} : vector<8x8xf32> to vector<8x1xf32>
    %c0_1 = arith.constant 0 : index
    %c0_2 = arith.constant 0 : index
    %4 = vector.load %arg2[%c0_1, %c0_2] : memref<8x128xbf16, #tpu.memory_space<vmem>>, vector<8x128xbf16>
    %5 = arith.extf %4 : vector<8x128xbf16> to vector<8x128xf32>
    %c0_3 = arith.constant 0 : index
    %c0_4 = arith.constant 0 : index
    %6 = vector.load %arg3[%c0_3, %c0_4] : memref<8x128xbf16, #tpu.memory_space<vmem>>, vector<8x128xbf16>
    %7 = arith.extf %6 : vector<8x128xbf16> to vector<8x128xf32>
    %8 = vector.broadcast %1 : vector<8x1xf32> to vector<8x128xf32>
    %9 = arith.mulf %8, %5 : vector<8x128xf32>
    %10 = vector.broadcast %2 : vector<8x1xf32> to vector<8x128xf32>
    %11 = arith.mulf %10, %7 : vector<8x128xf32>
    %12 = arith.addf %9, %11 : vector<8x128xf32>
    %13 = arith.truncf %12 : vector<8x128xf32> to vector<8x128xbf16>
    %c0_5 = arith.constant 0 : index
    %c0_6 = arith.constant 0 : index
    %14 = vector.load %arg5[%c0_5, %c0_6] : memref<128x128xbf16, #tpu.memory_space<vmem>>, vector<128x128xbf16>
    %cst = arith.constant dense<0.000000e+00> : vector<8x128xf32>
    %15 = tpu.matmul %13, %14, %cst {dimension_numbers = #tpu.dot_dimension_numbers<[1], [0], [0], [1], [0, 0, 1, 1], [], []>} : vector<8x128xbf16>, vector<128x128xbf16>, vector<8x128xf32> -> vector<8x128xf32>
    %c0_7 = arith.constant 0 : index
    %c0_8 = arith.constant 0 : index
    %16 = vector.load %arg4[%c0_7, %c0_8] : memref<8x128xbf16, #tpu.memory_space<vmem>>, vector<8x128xbf16>
    %c0_9 = arith.constant 0 : index
    %c0_10 = arith.constant 0 : index
    %17 = vector.load %arg6[%c0_9, %c0_10] : memref<128x128xbf16, #tpu.memory_space<vmem>>, vector<128x128xbf16>
    %cst_11 = arith.constant dense<0.000000e+00> : vector<8x128xf32>
    %18 = tpu.matmul %16, %17, %cst_11 {dimension_numbers = #tpu.dot_dimension_numbers<[1], [0], [0], [1], [0, 0, 1, 1], [], []>} : vector<8x128xbf16>, vector<128x128xbf16>, vector<8x128xf32> -> vector<8x128xf32>
    %19 = arith.addf %15, %18 : vector<8x128xf32>
    %c0_12 = arith.constant 0 : index
    %c0_13 = arith.constant 0 : index
    %20 = vector.load %arg7[%c0_12, %c0_13] : memref<1x128xf32, #tpu.memory_space<vmem>>, vector<1x128xf32>
    %21 = vector.broadcast %20 : vector<1x128xf32> to vector<8x128xf32>
    %22 = arith.addf %19, %21 : vector<8x128xf32>
    %cst_14 = arith.constant 0.000000e+00 : f32
    %23 = vector.broadcast %cst_14 : f32 to vector<8x128xf32>
    %24 = arith.maximumf %22, %23 : vector<8x128xf32>
    %25 = arith.truncf %24 : vector<8x128xf32> to vector<8x128xbf16>
    %c0_15 = arith.constant 0 : index
    %c0_16 = arith.constant 0 : index
    %26 = vector.load %arg8[%c0_15, %c0_16] : memref<128x128xbf16, #tpu.memory_space<vmem>>, vector<128x128xbf16>
    %cst_17 = arith.constant dense<0.000000e+00> : vector<8x128xf32>
    %27 = tpu.matmul %25, %26, %cst_17 {dimension_numbers = #tpu.dot_dimension_numbers<[1], [0], [0], [1], [0, 0, 1, 1], [], []>} : vector<8x128xbf16>, vector<128x128xbf16>, vector<8x128xf32> -> vector<8x128xf32>
    %c0_18 = arith.constant 0 : index
    %c0_19 = arith.constant 0 : index
    %28 = vector.load %arg9[%c0_18, %c0_19] : memref<1x128xf32, #tpu.memory_space<vmem>>, vector<1x128xf32>
    %29 = vector.broadcast %28 : vector<1x128xf32> to vector<8x128xf32>
    %30 = arith.addf %27, %29 : vector<8x128xf32>
    %31 = arith.subf %30, %7 : vector<8x128xf32>
    %32 = vector.broadcast %3 : vector<8x1xf32> to vector<8x128xf32>
    %33 = arith.mulf %31, %32 : vector<8x128xf32>
    %34 = arith.mulf %33, %33 : vector<8x128xf32>
    %cst_20 = arith.constant dense<0.000000e+00> : vector<128xf32>
    %35 = vector.multi_reduction <add>, %34, %cst_20 [0] : vector<8x128xf32> to vector<128xf32>
    %36 = vector.shape_cast %35 : vector<128xf32> to vector<1x128xf32>
    %37 = vector.shape_cast %36 : vector<1x128xf32> to vector<1x1x128xf32>
    %c0_21 = arith.constant 0 : index
    %c0_22 = arith.constant 0 : index
    %c0_23 = arith.constant 0 : index
    %38 = vector.load %arg10[%c0_21, %c0_22, %c0_23] : memref<1x1x128xf32, #tpu.memory_space<vmem>>, vector<1x1x128xf32>
    tpu.vector_store %arg10[%c0_21, %c0_22, %c0_23], %37 {strides = array<i32>} : memref<1x1x128xf32, #tpu.memory_space<vmem>>, vector<1x1x128xf32>,
    return
  }
  func.func @transform_0(%arg0: i32) -> (i32, i32) {
    %c0_i32 = arith.constant 0 : i32
    %c0_i32_0 = arith.constant 0 : i32
    return %arg0, %c0_i32 : i32, i32
  }
  func.func @transform_1(%arg0: i32) -> (i32, i32) {
    %c0_i32 = arith.constant 0 : i32
    %c0_i32_0 = arith.constant 0 : i32
    return %arg0, %c0_i32 : i32, i32
  }
  func.func @transform_2(%arg0: i32) -> (i32, i32) {
    %c0_i32 = arith.constant 0 : i32
    %c0_i32_0 = arith.constant 0 : i32
    return %arg0, %c0_i32 : i32, i32
  }
  func.func @transform_3(%arg0: i32) -> (i32, i32) {
    %c0_i32 = arith.constant 0 : i32
    %c0_i32_0 = arith.constant 0 : i32
    return %arg0, %c0_i32 : i32, i32
  }
  func.func @transform_4(%arg0: i32) -> (i32, i32) {
    %c0_i32 = arith.constant 0 : i32
    %c0_i32_0 = arith.constant 0 : i32
    %c0_i32_1 = arith.constant 0 : i32
    return %c0_i32, %c0_i32_0 : i32, i32
  }
  func.func @transform_5(%arg0: i32) -> (i32, i32) {
    %c0_i32 = arith.constant 0 : i32
    %c0_i32_0 = arith.constant 0 : i32
    %c0_i32_1 = arith.constant 0 : i32
    return %c0_i32, %c0_i32_0 : i32, i32
  }
  func.func @transform_6(%arg0: i32) -> (i32, i32) {
    %c0_i32 = arith.constant 0 : i32
    %c0_i32_0 = arith.constant 0 : i32
    %c0_i32_1 = arith.constant 0 : i32
    return %c0_i32, %c0_i32_0 : i32, i32
  }
  func.func @transform_7(%arg0: i32) -> (i32, i32) {
    %c0_i32 = arith.constant 0 : i32
    %c0_i32_0 = arith.constant 0 : i32
    %c0_i32_1 = arith.constant 0 : i32
    return %c0_i32, %c0_i32_0 : i32, i32
  }
  func.func @transform_8(%arg0: i32) -> (i32, i32) {
    %c0_i32 = arith.constant 0 : i32
    %c0_i32_0 = arith.constant 0 : i32
    %c0_i32_1 = arith.constant 0 : i32
    return %c0_i32, %c0_i32_0 : i32, i32
  }
  func.func @transform_9(%arg0: i32) -> (i32, i32, i32) {
    %c0_i32 = arith.constant 0 : i32
    %c0_i32_0 = arith.constant 0 : i32
    %c0_i32_1 = arith.constant 0 : i32
    return %arg0, %c0_i32, %c0_i32_0 : i32, i32, i32
  }
}

</mosaic_0001>

<bundles_post_ra>
// kernel: tpu_custom_call.1
= control target key start
LH: loop header
LB: loop body
LE: loop exit
PB: predicated region body
PF: predicated region fallthrough
CT: control target
= control target key end

     0   :  { %14 = vsyncpa [#allocation3], 0  ;;  %s868_s0 = inlined_call_operand.hbm [shape: f32[8,8], index: 0, kind: input, shape index: {}]   ;;  %s869_s1 = inlined_call_operand.hbm [shape: bf16[8,128], index: 1, kind: input, shape index: {}]   ;;  %s870_s2 = inlined_call_operand.hbm [shape: bf16[8,128], index: 2, kind: input, shape index: {}]   ;;  %s871_s3 = inlined_call_operand.hbm [shape: bf16[8,128], index: 3, kind: input, shape index: {}]   ;;  %s872_s4 = inlined_call_operand.hbm [shape: bf16[128,128], index: 4, kind: input, shape index: {}]   ;;  %s873_s5 = inlined_call_operand.hbm [shape: bf16[128,128], index: 5, kind: input, shape index: {}]   ;;  %s874_s6 = inlined_call_operand.vmem [shape: f32[1,128], index: 6, kind: input, shape index: {}]   ;;  %s875_s7 = inlined_call_operand.hbm [shape: bf16[128,128], index: 7, kind: input, shape index: {}]   ;;  %s876_s8 = inlined_call_operand.vmem [shape: f32[1,128], index: 8, kind: input, shape index: {}]   ;;  %s877_s9 = inlined_call_operand.hbm [shape: f32[1,1,128], index: 9, kind: output, shape index: {}]  }
   0x1   :  { %15 = vsyncpa [#allocation6], 0 }
   0x2   :  { %16 = vsyncpa [#allocation9], 0 }
   0x3   :  { %17 = vsyncpa [#allocation12], 0  ;;  %s35_s11 = sshll.u32 %s869_s1, 4  ;;  %s36_s11 = int_to_ptr.hbm [resolvable:$true] %s35_s11 }
   0x4   :  { %18 = vsyncpa [#allocation4], 0  ;;  %s770_s12 = smov [#allocation5]   ;;  %s57_s16 = sshll.u32 %s871_s3, 4  ;;  %s58_s16 = int_to_ptr.hbm [resolvable:$true] %s57_s16 }
   0x5   :  { %s37_s13 = sshll.u32 %s770_s12, 4  ;;  %s771_s17 = smov [#allocation8]   ;;  %s38_s13 = int_to_ptr.vmem [resolvable:$true] %s37_s13 }
   0x6   :  { %40 = dma.hbm_to_vmem [thread:$0]  %s36_s11, 64, %s38_s13, [#allocation6]  }
   0x7   :  { %s59_s18 = sshll.u32 %s771_s17, 4  ;;  %s80_s21 = sshll.u32 %s873_s5, 4  ;;  %s60_s18 = int_to_ptr.vmem [resolvable:$true] %s59_s18  ;;  %s81_s21 = int_to_ptr.hbm [resolvable:$true] %s80_s21 }
   0x8   :  { %62 = dma.hbm_to_vmem [thread:$0]  %s58_s16, 64, %s60_s18, [#allocation9]  }
   0x9   :  { %s772_s1 = smov [#allocation11]   ;;  %s24_s25 = sshll.u32 %s868_s0, 4  ;;  %s25_s25 = int_to_ptr.hbm [resolvable:$true] %s24_s25 }
   0xa   :  { %s82_s22 = sshll.u32 %s772_s1, 4  ;;  %s773_s26 = smov 64   ;;  %s83_s22 = int_to_ptr.vmem [resolvable:$true] %s82_s22 }
   0xb   :  { %s774_s3 = smov 4   ;;  %s775_s27 = smov [#allocation2]  }
   0xc   :  { %88 = dma.hbm_to_vmem [thread:$0]  %s81_s21, 1024, %s83_s22, [#allocation12], %s773_s26, %s773_s26, %s774_s3  }
   0xd   :  { %s26_s28 = sshll.u32 %s775_s27, 4  ;;  %s46_s10 = sshll.u32 %s870_s2, 4  ;;  %s27_s28 = int_to_ptr.vmem [resolvable:$true] %s26_s28  ;;  %s47_s10 = int_to_ptr.hbm [resolvable:$true] %s46_s10 }
   0xe   :  { %29 = dma.hbm_to_vmem [thread:$0]  %s25_s25, 128, %s27_s28, [#allocation3]  }
   0xf   :  { %s67_s12 = sshll.u32 %s872_s4, 4  ;;  %s776_s13 = smov [#allocation7]   ;;  %s68_s12 = int_to_ptr.hbm [resolvable:$true] %s67_s12 }
  0x10   :  { %s48_s14 = sshll.u32 %s776_s13, 4  ;;  %s777_s0 = smov [#allocation10]   ;;  %s49_s14 = int_to_ptr.vmem [resolvable:$true] %s48_s14 }
  0x11   :  { %51 = dma.hbm_to_vmem [thread:$0]  %s47_s10, 64, %s49_s14, [#allocation6]  }
  0x12   :  { %s69_s15 = sshll.u32 %s777_s0, 4  ;;  %s95_s18 = sshll.u32 %s875_s7, 4  ;;  %s70_s15 = int_to_ptr.vmem [resolvable:$true] %s69_s15  ;;  %s96_s18 = int_to_ptr.hbm [resolvable:$true] %s95_s18 }
  0x13   :  { %75 = dma.hbm_to_vmem [thread:$0]  %s68_s12, 1024, %s70_s15, [#allocation9], %s773_s26, %s773_s26, %s774_s3  }
  0x14   :  { %s778_s2 = smov [#allocation13]  }
  0x15   :  { %s97_s19 = sshll.u32 %s778_s2, 4  ;;  %s98_s19 = int_to_ptr.vmem [resolvable:$true] %s97_s19 }
  0x16   :  { %103 = dma.hbm_to_vmem [thread:$0]  %s96_s18, 1024, %s98_s19, [#allocation12], %s773_s26, %s773_s26, %s774_s3  }
  0x17   :  { %760 = dma.done.wait [#allocation3], 128  }
  0x18   :  { %761 = vsyncadd [#allocation3], 4294967168 }
  0x19   :  { %762 = dma.done.wait [#allocation6], 128  }
  0x1a   :  { %763 = vsyncadd [#allocation6], 4294967168 }
  0x1b   :  { %764 = dma.done.wait [#allocation9], 1088  }
  0x1c   :  { %765 = vsyncadd [#allocation9], 4294966208 }
  0x1d   :  { %766 = dma.done.wait [#allocation12], 2048  }
  0x1e   :  { %767 = vsyncadd [#allocation12], 4294965248  ;;  %v779_v0 = vmov 0   ;;  %v854_v1 = vld [vmem:[#allocation2] sm:$0xff]  ;;  %v540_v2 = vld [vmem:[#allocation11 + $0x38] sm:$0xff]  ;;  %v780_v8 = vmov 1  }
  0x1f   :  { %562 = vset.pattern.permute.xlu0 %v779_v0  ;;  %v532_v3 = vld [vmem:[#allocation10 + $0x38] sm:$0xff]  ;;  %233 = vmatpush.bf16.msra.mxu0 %v540_v2  ;;  %v539_v4 = vld [vmem:[#allocation11 + $0x30] sm:$0xff]  ;;  %v538_v6 = vld [vmem:[#allocation11 + $0x28] sm:$0xff]  ;;  %v781_v40 = vmov 2   ;;  %s416_s24 = sshll.u32 %s877_s9, 4  ;;  %s417_s24 = int_to_ptr.hbm [resolvable:$true] %s416_s24 }
  0x20   :  { %141 = vperm.xlu0 %562, %v854_v1   ;;  %294 = vmatpush.bf16.msra.mxu1 %v532_v3  ;;  %v531_v5 = vld [vmem:[#allocation10 + $0x30] sm:$0xff]  ;;  %v530_v7 = vld [vmem:[#allocation10 + $0x28] sm:$0xff]  ;;  %v537_v9 = vld [vmem:[#allocation11 + $0x20] sm:$0xff] }
  0x21   :  { %v529_v10 = vld [vmem:[#allocation10 + $0x20] sm:$0xff]  ;;  %v536_v11 = vld [vmem:[#allocation11 + $0x18] sm:$0xff]  ;;  %v535_v12 = vld [vmem:[#allocation11 + $0x10] sm:$0xff]  ;;  %564 = vset.pattern.permute.xlu1 %v781_v40 }
  0x22   :  { %v534_v13 = vld [vmem:[#allocation11 + $0x8] sm:$0xff]  ;;  %v528_v14 = vld [vmem:[#allocation10 + $0x18] sm:$0xff]  ;;  %v533_v15 = vld [vmem:[#allocation11] sm:$0xff]  ;;  %397 = vperm.xlu1 %564, %v854_v1  }
  0x23   :  { %234 = vmatpush.bf16.msra.mxu0 %v539_v4  ;;  %v527_v16 = vld [vmem:[#allocation10 + $0x10] sm:$0xff]  ;;  %v168_v17 = vld [vmem:[#allocation8] sm:$0xf]  ;;  %v526_v18 = vld [vmem:[#allocation10 + $0x8] sm:$0xff] }
  0x24   :  { %295 = vmatpush.bf16.msra.mxu1 %v531_v5  ;;  %v525_v19 = vld [vmem:[#allocation10] sm:$0xff]  ;;  %v548_v20 = vld [vmem:[#allocation13 + $0x38] sm:$0xff]  ;;  %v547_v21 = vld [vmem:[#allocation13 + $0x30] sm:$0xff] }
  0x25   :  { %382 = vmatpush.bf16.msra.mxu2 %v548_v20  ;;  %v546_v22 = vld [vmem:[#allocation13 + $0x28] sm:$0xff]  ;;  %v545_v23 = vld [vmem:[#allocation13 + $0x20] sm:$0xff]  ;;  %v135_v25 = vld [vmem:[#allocation5] sm:$0xf] }
  0x26   :  { %v137_v26 = vld [vmem:[#allocation7] sm:$0xf]  ;;  %v136_v27 = vunpack.c.l.bf16 %v135_v25  ;;  %v543_v35 = vld [vmem:[#allocation13 + $0x10] sm:$0xff]  ;;  %v542_v38 = vld [vmem:[#allocation13 + $0x8] sm:$0xff] }
  0x27   :  { %235 = vmatpush.bf16.msra.mxu0 %v538_v6  ;;  %v138_v28 = vunpack.c.l.bf16 %v137_v26  ;;  %v544_v34 = vld [vmem:[#allocation13 + $0x18] sm:$0xff]  ;;  %v541_v39 = vld [vmem:[#allocation13] sm:$0xff]  ;;  %v566_v41 = vld [vmem:[%s874_s6] ss:$0 sm:$0xff]  ;;  %s782_s6 = smov [#allocation14]  }
  0x28   :  { %563 = vset.pattern.permute.xlu0 %v780_v8  ;;  %296 = vmatpush.bf16.msra.mxu1 %v530_v7  ;;  %v567_v48 = vld [vmem:[%s876_s8] ss:$0 sm:$0xff]  ;;  %s414_s1 = sshll.u32 %s782_s6, 4  ;;  %s415_s1 = int_to_ptr.vmem [resolvable:$true] %s414_s1 }
  0x29   :  { %146 = vperm.xlu0 %563, %v854_v1   ;;  %383 = vmatpush.bf16.msra.mxu2 %v547_v21 }
  0x2b   :  { %236 = vmatpush.bf16.msra.mxu0 %v537_v9 }
  0x2c   :  { %297 = vmatpush.bf16.msra.mxu1 %v529_v10 }
  0x2d   :  { %384 = vmatpush.bf16.msra.mxu2 %v546_v22 }
  0x2f   :  { %237 = vmatpush.bf16.msra.mxu0 %v536_v11 }
  0x30   :  { %298 = vmatpush.bf16.msra.mxu1 %v528_v14 }
  0x31   :  { %385 = vmatpush.bf16.msra.mxu2 %v545_v23  ;;  %565 = vset.pattern.permute.xlu0 %v781_v40 }
  0x33   :  { %238 = vmatpush.bf16.msra.mxu0 %v535_v12 }
  0x34   :  { %299 = vmatpush.bf16.msra.mxu1 %v527_v16 }
  0x35   :  { %386 = vmatpush.bf16.msra.mxu2 %v544_v34 }
  0x37   :  { %239 = vmatpush.bf16.msra.mxu0 %v534_v13 }
  0x38   :  { %300 = vmatpush.bf16.msra.mxu1 %v526_v18 }
  0x39   :  { %387 = vmatpush.bf16.msra.mxu2 %v543_v35 }
  0x3b   :  { %240 = vmatpush.bf16.msra.mxu0 %v533_v15 }
  0x3c   :  { %301 = vmatpush.bf16.msra.mxu1 %v525_v19 }
  0x3d   :  { %388 = vmatpush.bf16.msra.mxu2 %v542_v38 }
  0x3e   :  { %241 = vmatmul.bf16.vlgmr.msra.gmra.mxu0 %v168_v17 }
  0x41   :  { %389 = vmatpush.bf16.msra.mxu2 %v541_v39 }
  0x92   :  { %v142_v24 = vpop.permute.xlu0 %141 }
  0x93   :  { %v144_v30 = vmul.f32 %v142_v24, %v136_v27 }
  0x94   :  { %v398_v51 = vpop.permute.xlu1 %397 }
  0x9b   :  { %v147_v29 = vpop.permute.xlu0 %146 }
  0x9c   :  { %v149_v31 = vmul.f32 %v147_v29, %v138_v28 }
  0x9e   :  { %v150_v32 = vadd.f32 %v149_v31, %v144_v30 }
  0xa0   :  { %v151_v33 = vpack.c.bf16 %v150_v32, %v150_v32 }
  0xa2   :  { %302 = vmatmul.bf16.vlgmr.msra.gmra.mxu1 %v151_v33 }
  0xbb   :  { %v242_v36 = vpop.f32.mrf.mxu0 }
  0xc3   :  { %v244_v37 = vpop.f32.mrf.mxu0 }
 0x11f   :  { %v303_v42 = vpop.f32.mrf.mxu1 }
 0x120   :  { %v304_v43 = vadd.f32 %v303_v42, %v242_v36 }
 0x122   :  { %v311_v44 = vadd.f32 %v566_v41, %v304_v43 }
 0x124   :  { %v312_v45 = vmax.f32 %v311_v44, 0.0 }
 0x126   :  { %v313_v46 = vpack.c.bf16 %v312_v45, %v312_v45 }
 0x127   :  { %v305_v47 = vpop.f32.mrf.mxu1 }
 0x128   :  { %390 = vmatmul.bf16.vlgmr.msra.gmra.mxu2 %v313_v46 }
 0x1ab   :  { %v391_v49 = vpop.f32.mrf.mxu2 }
 0x1ac   :  { %v392_v50 = vadd.f32 %v567_v48, %v391_v49 }
 0x1ae   :  { %v395_v52 = vsub.f32 %v392_v50, %v138_v28 }
 0x1b0   :  { %v400_v53 = vmul.f32 %v398_v51, %v395_v52 }
 0x1b2   :  { %v401_v54 = vmul.f32 %v400_v53, %v400_v53 }
 0x1b3   :  { %v393_v55 = vpop.f32.mrf.mxu2 }
 0x1b4   :  { %v402_v56 = vrot.slane %v401_v54, 4 }
 0x1b6   :  { %v403_v57 = vadd.f32 %v402_v56, %v401_v54 }
 0x1b8   :  { %v404_v58 = vrot.slane %v403_v57, 2 }
 0x1ba   :  { %v405_v59 = vadd.f32 %v404_v58, %v403_v57 }
 0x1bc   :  { %v406_v60 = vrot.slane %v405_v59, 1 }
 0x1be   :  { %v407_v61 = vadd.f32 %v406_v60, %v405_v59 }
 0x1c0   :  { %408 = vst [vmem:[#allocation14] sm:$0x1] %v407_v61 }
 0x1c1   :  { %419 = dma.vmem_to_hbm [thread:$0]  %s415_s1, 16, %s417_s24, [#allocation4]  }
 0x1c2   :  { %768 = dma.done.wait [#allocation4], 16  }
 0x1c3   :  { %769 = vsyncadd [#allocation4], 4294967280 }
 0x1c4   :  { %424 = vsyncpa [#allocation3], 1 }
 0x1c5   :  { %425 = vsyncpa [#allocation6], 1 }
 0x1c6   :  { %426 = vsyncpa [#allocation9], 1 }
 0x1c7   :  { %427 = vsyncpa [#allocation12], 1 }
 0x1c8   :  { %428 = vsyncpa [#allocation4], 1 }

</bundles_post_ra>
